<compile_context>
chip_gen: v5e
topology: v5e:2x2
jax: 0.10.0
libtpu: 0.0.40
codegen_flags: <defaults>
</compile_context>

<pallas_src>
import functools

import jax
import jax.numpy as jnp
from jax.experimental import pallas as pl
from jax.experimental.pallas import tpu as pltpu

LN_EPS = 1e-5  # PyTorch nn.LayerNorm default eps


def _round_up(n, m):
    return ((n + m - 1) // m) * m


def _encoder_kernel(num_layers, *refs):
    # refs = (x_ref,
    #         w0, b0, w1, b1, ..., w_{L-1}, b_{L-1},   # LinearReLU stack
    #         w_head, b_head,                          # fused mu|logvar head (lane-padded)
    #         out_ref)                                 # (tile_m, head_pad) slab
    x_ref = refs[0]
    layer_refs = refs[1:1 + 2 * num_layers]
    w_head_ref, b_head_ref = refs[1 + 2 * num_layers:1 + 2 * num_layers + 2]
    out_ref = refs[-1]

    h = x_ref[...]  # already f32 (wrapper guarantees)

    # LinearReLU stack: Linear -> LayerNorm(elementwise_affine=False) -> ReLU
    for l in range(num_layers):
        w = layer_refs[2 * l][...]
        b = layer_refs[2 * l + 1][...]          # (1, out) broadcast in the add
        h = jnp.dot(h, w, preferred_element_type=jnp.float32) + b

        # One-pass LayerNorm statistics: var = E[h^2] - E[h]^2
        inv_n = 1.0 / h.shape[-1]
        mean = jnp.sum(h, axis=-1, keepdims=True) * inv_n
        ex2 = jnp.sum(h * h, axis=-1, keepdims=True) * inv_n
        var = jnp.maximum(ex2 - mean * mean, 0.0)
        h = (h - mean) * jax.lax.rsqrt(var + LN_EPS)
        h = jnp.maximum(h, 0.0)

    # Fused mu|logvar head: one matmul into a 128-lane-padded output slab.
    out = jnp.dot(h, w_head_ref[...],
                  preferred_element_type=jnp.float32) + b_head_ref[...]
    out_ref[...] = out.astype(out_ref.dtype)


def encoder_forward(x, params, *, tile_m=256):
    """params: dict with
         'layers': list of (W (in,out), b (1,out))  -- x2h followed by seq_nn layers
         'mu':     (W (h,z), b (1,z))
         'logvar': (W (h,z), b (1,z))
    """
    batch, x_dim = x.shape
    layers = params["layers"]
    num_layers = len(layers)
    h_dim = layers[0][0].shape[1]

    if x.dtype != jnp.float32:
        x = x.astype(jnp.float32)

    # --- batch tiling: cap tile to (8-rounded) batch, pad batch to a tile multiple.
    tile_m = max(8, min(tile_m, _round_up(batch, 8)))
    padded_batch = _round_up(batch, tile_m)
    if padded_batch != batch:
        x = jnp.pad(x, ((0, padded_batch - batch), (0, 0)))
    grid = (padded_batch // tile_m,)

    # --- fuse mu/logvar heads and pad output columns to a multiple of 128 lanes.
    w_mu, b_mu = params["mu"]
    w_lv, b_lv = params["logvar"]
    z_dim = w_mu.shape[1]
    head_out = 2 * z_dim
    head_pad = max(128, _round_up(head_out, 128))
    w_head = jnp.zeros((h_dim, head_pad), jnp.float32)
    w_head = w_head.at[:, :z_dim].set(w_mu).at[:, z_dim:head_out].set(w_lv)
    b_head = jnp.zeros((1, head_pad), jnp.float32)
    b_head = b_head.at[:, :z_dim].set(b_mu).at[:, z_dim:head_out].set(b_lv)

    kernel = functools.partial(_encoder_kernel, num_layers)

    def full_spec(shape):
        # Grid-invariant operand: same block every step (Pallas skips re-DMA).
        return pl.BlockSpec(shape, lambda i: (0, 0))

    operands = [x]
    in_specs = [pl.BlockSpec((tile_m, x_dim), lambda i: (i, 0))]
    for (w, b) in layers:
        operands += [w, b]
        in_specs += [full_spec(w.shape), full_spec(b.shape)]
    operands += [w_head, b_head]
    in_specs += [full_spec(w_head.shape), full_spec(b_head.shape)]

    out_shape = jax.ShapeDtypeStruct((padded_batch, head_pad), jnp.float32)
    out_specs = pl.BlockSpec((tile_m, head_pad), lambda i: (i, 0))

    grid_spec = pltpu.PrefetchScalarGridSpec(
        num_scalar_prefetch=0,
        grid=grid,
        in_specs=in_specs,
        out_specs=out_specs,
    )

    out = pl.pallas_call(
        kernel,
        out_shape=out_shape,
        grid_spec=grid_spec,
        compiler_params=pltpu.CompilerParams(
            dimension_semantics=("parallel",)),
    )(*operands)

    out = out[:batch]
    mu = out[:, :z_dim]
    logvar = out[:, z_dim:head_out]
    return mu, logvar


def init_encoder_params(key, num_h_layers, x_dim, h_dim, z_dim):
    """Deterministic synthetic parameters mirroring the module structure:
    x2h (x_dim->h_dim), (num_h_layers-1) LinearReLU(h_dim->h_dim), h2mu and
    h2logvar (h_dim->z_dim). Weights stored as (in, out); biases as (1, out)."""
    def linear(key, d_in, d_out):
        kw, kb = jax.random.split(key)
        scale = 1.0 / jnp.sqrt(d_in)
        w = jax.random.uniform(kw, (d_in, d_out), jnp.float32, -scale, scale)
        b = jax.random.uniform(kb, (1, d_out), jnp.float32, -scale, scale)
        return w, b

    keys = jax.random.split(key, num_h_layers + 2)
    layers = [linear(keys[0], x_dim, h_dim)]
    for i in range(num_h_layers - 1):
        layers.append(linear(keys[1 + i], h_dim, h_dim))
    mu = linear(keys[num_h_layers], h_dim, z_dim)
    logvar = linear(keys[num_h_layers + 1], h_dim, z_dim)
    return {"layers": layers, "mu": mu, "logvar": logvar}


def encoder_reference(x, params):
    """Pure-JAX reference for correctness checking."""
    h = x.astype(jnp.float32)
    for (w, b) in params["layers"]:
        h = h @ w + b
        mean = jnp.mean(h, axis=-1, keepdims=True)
        var = jnp.mean((h - mean) ** 2, axis=-1, keepdims=True)
        h = (h - mean) / jnp.sqrt(var + LN_EPS)
        h = jnp.maximum(h, 0.0)
    mu = h @ params["mu"][0] + params["mu"][1]
    logvar = h @ params["logvar"][0] + params["logvar"][1]
    return mu, logvar


if __name__ == "__main__":
    num_h_layers, x_dim, h_dim, z_dim = 3, 16, 32, 8
    key = jax.random.PRNGKey(0)
    k_params, k_x1, k_x2 = jax.random.split(key, 3)
    params = init_encoder_params(k_params, num_h_layers, x_dim, h_dim, z_dim)

    # Case 1: small batch (grid of 1, tile capped to the batch).
    x1 = jax.random.normal(k_x1, (16, x_dim), jnp.float32)
    mu1, lv1 = jax.block_until_ready(encoder_forward(x1, params))
    mu1_ref, lv1_ref = encoder_reference(x1, params)
    assert jnp.allclose(mu1, mu1_ref, atol=1e-4, rtol=1e-4)
    assert jnp.allclose(lv1, lv1_ref, atol=1e-4, rtol=1e-4)

    # Case 2: batch not a tile multiple -> exercises padding + multi-step grid.
    x2 = jax.random.normal(k_x2, (200, x_dim), jnp.float32)
    mu2, lv2 = jax.block_until_ready(encoder_forward(x2, params, tile_m=128))
    mu2_ref, lv2_ref = encoder_reference(x2, params)
    assert jnp.allclose(mu2, mu2_ref, atol=1e-4, rtol=1e-4)
    assert jnp.allclose(lv2, lv2_ref, atol=1e-4, rtol=1e-4)

    print("KERNEL_OK")
</pallas_src>

<mosaic_0001>
module attributes {stable_mosaic.version = 11 : i64} {
  func.func @_encoder_kernel(%arg0: i32, %arg1: memref<16x16xf32, #tpu.memory_space<vmem>>, %arg2: memref<16x32xf32, #tpu.memory_space<vmem>>, %arg3: memref<1x32xf32, #tpu.memory_space<vmem>>, %arg4: memref<32x32xf32, #tpu.memory_space<vmem>>, %arg5: memref<1x32xf32, #tpu.memory_space<vmem>>, %arg6: memref<32x32xf32, #tpu.memory_space<vmem>>, %arg7: memref<1x32xf32, #tpu.memory_space<vmem>>, %arg8: memref<32x128xf32, #tpu.memory_space<vmem>>, %arg9: memref<1x128xf32, #tpu.memory_space<vmem>>, %arg10: memref<16x128xf32, #tpu.memory_space<vmem>>) attributes {dimension_semantics = [#tpu.dimension_semantics<parallel>], iteration_bounds = array<i64: 1>, scalar_prefetch = 0 : i64, scratch_operands = 0 : i64, tpu.core_type = #tpu.core_type<tc>, window_params = [{transform_indices = @transform_0, window_bounds = array<i64: 16, 16>}, {pipeline_mode = #tpu.pipeline_mode<synchronous>, transform_indices = @transform_1, window_bounds = array<i64: 16, 32>}, {pipeline_mode = #tpu.pipeline_mode<synchronous>, transform_indices = @transform_2, window_bounds = array<i64: 1, 32>}, {pipeline_mode = #tpu.pipeline_mode<synchronous>, transform_indices = @transform_3, window_bounds = array<i64: 32, 32>}, {pipeline_mode = #tpu.pipeline_mode<synchronous>, transform_indices = @transform_4, window_bounds = array<i64: 1, 32>}, {pipeline_mode = #tpu.pipeline_mode<synchronous>, transform_indices = @transform_5, window_bounds = array<i64: 32, 32>}, {pipeline_mode = #tpu.pipeline_mode<synchronous>, transform_indices = @transform_6, window_bounds = array<i64: 1, 32>}, {pipeline_mode = #tpu.pipeline_mode<synchronous>, transform_indices = @transform_7, window_bounds = array<i64: 32, 128>}, {pipeline_mode = #tpu.pipeline_mode<synchronous>, transform_indices = @transform_8, window_bounds = array<i64: 1, 128>}, {transform_indices = @transform_9, window_bounds = array<i64: 16, 128>}]} {
    %c0 = arith.constant 0 : index
    %c0_0 = arith.constant 0 : index
    %0 = vector.load %arg1[%c0, %c0_0] : memref<16x16xf32, #tpu.memory_space<vmem>>, vector<16x16xf32>
    %c0_1 = arith.constant 0 : index
    %c0_2 = arith.constant 0 : index
    %1 = vector.load %arg2[%c0_1, %c0_2] : memref<16x32xf32, #tpu.memory_space<vmem>>, vector<16x32xf32>
    %c0_3 = arith.constant 0 : index
    %c0_4 = arith.constant 0 : index
    %2 = vector.load %arg3[%c0_3, %c0_4] : memref<1x32xf32, #tpu.memory_space<vmem>>, vector<1x32xf32>
    %cst = arith.constant dense<0.000000e+00> : vector<16x32xf32>
    %3 = tpu.matmul %0, %1, %cst {dimension_numbers = #tpu.dot_dimension_numbers<[1], [0], [0], [1], [0, 0, 1, 1], [], []>} : vector<16x16xf32>, vector<16x32xf32>, vector<16x32xf32> -> vector<16x32xf32>
    %4 = vector.broadcast %2 : vector<1x32xf32> to vector<16x32xf32>
    %5 = arith.addf %3, %4 : vector<16x32xf32>
    %cst_5 = arith.constant dense<0.000000e+00> : vector<16xf32>
    %6 = vector.multi_reduction <add>, %5, %cst_5 [1] : vector<16x32xf32> to vector<16xf32>
    %7 = vector.shape_cast %6 : vector<16xf32> to vector<16x1xf32>
    %cst_6 = arith.constant 3.125000e-02 : f32
    %8 = vector.broadcast %cst_6 : f32 to vector<16x1xf32>
    %9 = arith.mulf %7, %8 : vector<16x1xf32>
    %10 = arith.mulf %5, %5 : vector<16x32xf32>
    %cst_7 = arith.constant dense<0.000000e+00> : vector<16xf32>
    %11 = vector.multi_reduction <add>, %10, %cst_7 [1] : vector<16x32xf32> to vector<16xf32>
    %12 = vector.shape_cast %11 : vector<16xf32> to vector<16x1xf32>
    %cst_8 = arith.constant 3.125000e-02 : f32
    %13 = vector.broadcast %cst_8 : f32 to vector<16x1xf32>
    %14 = arith.mulf %12, %13 : vector<16x1xf32>
    %15 = arith.mulf %9, %9 : vector<16x1xf32>
    %16 = arith.subf %14, %15 : vector<16x1xf32>
    %cst_9 = arith.constant 0.000000e+00 : f32
    %17 = vector.broadcast %cst_9 : f32 to vector<16x1xf32>
    %18 = arith.maximumf %16, %17 : vector<16x1xf32>
    %19 = vector.broadcast %9 : vector<16x1xf32> to vector<16x32xf32>
    %20 = arith.subf %5, %19 : vector<16x32xf32>
    %cst_10 = arith.constant 9.99999974E-6 : f32
    %21 = vector.broadcast %cst_10 : f32 to vector<16x1xf32>
    %22 = arith.addf %18, %21 : vector<16x1xf32>
    %23 = math.rsqrt %22 : vector<16x1xf32>
    %24 = vector.broadcast %23 : vector<16x1xf32> to vector<16x32xf32>
    %25 = arith.mulf %20, %24 : vector<16x32xf32>
    %cst_11 = arith.constant 0.000000e+00 : f32
    %26 = vector.broadcast %cst_11 : f32 to vector<16x32xf32>
    %27 = arith.maximumf %25, %26 : vector<16x32xf32>
    %c0_12 = arith.constant 0 : index
    %c0_13 = arith.constant 0 : index
    %28 = vector.load %arg4[%c0_12, %c0_13] : memref<32x32xf32, #tpu.memory_space<vmem>>, vector<32x32xf32>
    %c0_14 = arith.constant 0 : index
    %c0_15 = arith.constant 0 : index
    %29 = vector.load %arg5[%c0_14, %c0_15] : memref<1x32xf32, #tpu.memory_space<vmem>>, vector<1x32xf32>
    %cst_16 = arith.constant dense<0.000000e+00> : vector<16x32xf32>
    %30 = tpu.matmul %27, %28, %cst_16 {dimension_numbers = #tpu.dot_dimension_numbers<[1], [0], [0], [1], [0, 0, 1, 1], [], []>} : vector<16x32xf32>, vector<32x32xf32>, vector<16x32xf32> -> vector<16x32xf32>
    %31 = vector.broadcast %29 : vector<1x32xf32> to vector<16x32xf32>
    %32 = arith.addf %30, %31 : vector<16x32xf32>
    %cst_17 = arith.constant dense<0.000000e+00> : vector<16xf32>
    %33 = vector.multi_reduction <add>, %32, %cst_17 [1] : vector<16x32xf32> to vector<16xf32>
    %34 = vector.shape_cast %33 : vector<16xf32> to vector<16x1xf32>
    %cst_18 = arith.constant 3.125000e-02 : f32
    %35 = vector.broadcast %cst_18 : f32 to vector<16x1xf32>
    %36 = arith.mulf %34, %35 : vector<16x1xf32>
    %37 = arith.mulf %32, %32 : vector<16x32xf32>
    %cst_19 = arith.constant dense<0.000000e+00> : vector<16xf32>
    %38 = vector.multi_reduction <add>, %37, %cst_19 [1] : vector<16x32xf32> to vector<16xf32>
    %39 = vector.shape_cast %38 : vector<16xf32> to vector<16x1xf32>
    %cst_20 = arith.constant 3.125000e-02 : f32
    %40 = vector.broadcast %cst_20 : f32 to vector<16x1xf32>
    %41 = arith.mulf %39, %40 : vector<16x1xf32>
    %42 = arith.mulf %36, %36 : vector<16x1xf32>
    %43 = arith.subf %41, %42 : vector<16x1xf32>
    %cst_21 = arith.constant 0.000000e+00 : f32
    %44 = vector.broadcast %cst_21 : f32 to vector<16x1xf32>
    %45 = arith.maximumf %43, %44 : vector<16x1xf32>
    %46 = vector.broadcast %36 : vector<16x1xf32> to vector<16x32xf32>
    %47 = arith.subf %32, %46 : vector<16x32xf32>
    %cst_22 = arith.constant 9.99999974E-6 : f32
    %48 = vector.broadcast %cst_22 : f32 to vector<16x1xf32>
    %49 = arith.addf %45, %48 : vector<16x1xf32>
    %50 = math.rsqrt %49 : vector<16x1xf32>
    %51 = vector.broadcast %50 : vector<16x1xf32> to vector<16x32xf32>
    %52 = arith.mulf %47, %51 : vector<16x32xf32>
    %cst_23 = arith.constant 0.000000e+00 : f32
    %53 = vector.broadcast %cst_23 : f32 to vector<16x32xf32>
    %54 = arith.maximumf %52, %53 : vector<16x32xf32>
    %c0_24 = arith.constant 0 : index
    %c0_25 = arith.constant 0 : index
    %55 = vector.load %arg6[%c0_24, %c0_25] : memref<32x32xf32, #tpu.memory_space<vmem>>, vector<32x32xf32>
    %c0_26 = arith.constant 0 : index
    %c0_27 = arith.constant 0 : index
    %56 = vector.load %arg7[%c0_26, %c0_27] : memref<1x32xf32, #tpu.memory_space<vmem>>, vector<1x32xf32>
    %cst_28 = arith.constant dense<0.000000e+00> : vector<16x32xf32>
    %57 = tpu.matmul %54, %55, %cst_28 {dimension_numbers = #tpu.dot_dimension_numbers<[1], [0], [0], [1], [0, 0, 1, 1], [], []>} : vector<16x32xf32>, vector<32x32xf32>, vector<16x32xf32> -> vector<16x32xf32>
    %58 = vector.broadcast %56 : vector<1x32xf32> to vector<16x32xf32>
    %59 = arith.addf %57, %58 : vector<16x32xf32>
    %cst_29 = arith.constant dense<0.000000e+00> : vector<16xf32>
    %60 = vector.multi_reduction <add>, %59, %cst_29 [1] : vector<16x32xf32> to vector<16xf32>
    %61 = vector.shape_cast %60 : vector<16xf32> to vector<16x1xf32>
    %cst_30 = arith.constant 3.125000e-02 : f32
    %62 = vector.broadcast %cst_30 : f32 to vector<16x1xf32>
    %63 = arith.mulf %61, %62 : vector<16x1xf32>
    %64 = arith.mulf %59, %59 : vector<16x32xf32>
    %cst_31 = arith.constant dense<0.000000e+00> : vector<16xf32>
    %65 = vector.multi_reduction <add>, %64, %cst_31 [1] : vector<16x32xf32> to vector<16xf32>
    %66 = vector.shape_cast %65 : vector<16xf32> to vector<16x1xf32>
    %cst_32 = arith.constant 3.125000e-02 : f32
    %67 = vector.broadcast %cst_32 : f32 to vector<16x1xf32>
    %68 = arith.mulf %66, %67 : vector<16x1xf32>
    %69 = arith.mulf %63, %63 : vector<16x1xf32>
    %70 = arith.subf %68, %69 : vector<16x1xf32>
    %cst_33 = arith.constant 0.000000e+00 : f32
    %71 = vector.broadcast %cst_33 : f32 to vector<16x1xf32>
    %72 = arith.maximumf %70, %71 : vector<16x1xf32>
    %73 = vector.broadcast %63 : vector<16x1xf32> to vector<16x32xf32>
    %74 = arith.subf %59, %73 : vector<16x32xf32>
    %cst_34 = arith.constant 9.99999974E-6 : f32
    %75 = vector.broadcast %cst_34 : f32 to vector<16x1xf32>
    %76 = arith.addf %72, %75 : vector<16x1xf32>
    %77 = math.rsqrt %76 : vector<16x1xf32>
    %78 = vector.broadcast %77 : vector<16x1xf32> to vector<16x32xf32>
    %79 = arith.mulf %74, %78 : vector<16x32xf32>
    %cst_35 = arith.constant 0.000000e+00 : f32
    %80 = vector.broadcast %cst_35 : f32 to vector<16x32xf32>
    %81 = arith.maximumf %79, %80 : vector<16x32xf32>
    %c0_36 = arith.constant 0 : index
    %c0_37 = arith.constant 0 : index
    %82 = vector.load %arg8[%c0_36, %c0_37] : memref<32x128xf32, #tpu.memory_space<vmem>>, vector<32x128xf32>
    %cst_38 = arith.constant dense<0.000000e+00> : vector<16x128xf32>
    %83 = tpu.matmul %81, %82, %cst_38 {dimension_numbers = #tpu.dot_dimension_numbers<[1], [0], [0], [1], [0, 0, 1, 1], [], []>} : vector<16x32xf32>, vector<32x128xf32>, vector<16x128xf32> -> vector<16x128xf32>
    %c0_39 = arith.constant 0 : index
    %c0_40 = arith.constant 0 : index
    %84 = vector.load %arg9[%c0_39, %c0_40] : memref<1x128xf32, #tpu.memory_space<vmem>>, vector<1x128xf32>
    %85 = vector.broadcast %84 : vector<1x128xf32> to vector<16x128xf32>
    %86 = arith.addf %83, %85 : vector<16x128xf32>
    %c0_41 = arith.constant 0 : index
    %c0_42 = arith.constant 0 : index
    %87 = vector.load %arg10[%c0_41, %c0_42] : memref<16x128xf32, #tpu.memory_space<vmem>>, vector<16x128xf32>
    tpu.vector_store %arg10[%c0_41, %c0_42], %86 {strides = array<i32>} : memref<16x128xf32, #tpu.memory_space<vmem>>, vector<16x128xf32>,
    return
  }
  func.func @transform_0(%arg0: i32) -> (i32, i32) {
    %c0_i32 = arith.constant 0 : i32
    %c0_i32_0 = arith.constant 0 : i32
    return %arg0, %c0_i32 : i32, i32
  }
  func.func @transform_1(%arg0: i32) -> (i32, i32) {
    %c0_i32 = arith.constant 0 : i32
    %c0_i32_0 = arith.constant 0 : i32
    %c0_i32_1 = arith.constant 0 : i32
    return %c0_i32, %c0_i32_0 : i32, i32
  }
  func.func @transform_2(%arg0: i32) -> (i32, i32) {
    %c0_i32 = arith.constant 0 : i32
    %c0_i32_0 = arith.constant 0 : i32
    %c0_i32_1 = arith.constant 0 : i32
    return %c0_i32, %c0_i32_0 : i32, i32
  }
  func.func @transform_3(%arg0: i32) -> (i32, i32) {
    %c0_i32 = arith.constant 0 : i32
    %c0_i32_0 = arith.constant 0 : i32
    %c0_i32_1 = arith.constant 0 : i32
    return %c0_i32, %c0_i32_0 : i32, i32
  }
  func.func @transform_4(%arg0: i32) -> (i32, i32) {
    %c0_i32 = arith.constant 0 : i32
    %c0_i32_0 = arith.constant 0 : i32
    %c0_i32_1 = arith.constant 0 : i32
    return %c0_i32, %c0_i32_0 : i32, i32
  }
  func.func @transform_5(%arg0: i32) -> (i32, i32) {
    %c0_i32 = arith.constant 0 : i32
    %c0_i32_0 = arith.constant 0 : i32
    %c0_i32_1 = arith.constant 0 : i32
    return %c0_i32, %c0_i32_0 : i32, i32
  }
  func.func @transform_6(%arg0: i32) -> (i32, i32) {
    %c0_i32 = arith.constant 0 : i32
    %c0_i32_0 = arith.constant 0 : i32
    %c0_i32_1 = arith.constant 0 : i32
    return %c0_i32, %c0_i32_0 : i32, i32
  }
  func.func @transform_7(%arg0: i32) -> (i32, i32) {
    %c0_i32 = arith.constant 0 : i32
    %c0_i32_0 = arith.constant 0 : i32
    %c0_i32_1 = arith.constant 0 : i32
    return %c0_i32, %c0_i32_0 : i32, i32
  }
  func.func @transform_8(%arg0: i32) -> (i32, i32) {
    %c0_i32 = arith.constant 0 : i32
    %c0_i32_0 = arith.constant 0 : i32
    %c0_i32_1 = arith.constant 0 : i32
    return %c0_i32, %c0_i32_0 : i32, i32
  }
  func.func @transform_9(%arg0: i32) -> (i32, i32) {
    %c0_i32 = arith.constant 0 : i32
    %c0_i32_0 = arith.constant 0 : i32
    return %arg0, %c0_i32 : i32, i32
  }
}

</mosaic_0001>

<bundles_post_ra>
// kernel: tpu_custom_call.1
= control target key start
LH: loop header
LB: loop body
LE: loop exit
PB: predicated region body
PF: predicated region fallthrough
CT: control target
= control target key end

     0   :  { %14 = vsyncpa [#allocation3], 0  ;;  %s748_s0 = inlined_call_operand.hbm [shape: f32[16,16], index: 0, kind: input, shape index: {}]   ;;  %s749_s1 = inlined_call_operand.hbm [shape: f32[16,32], index: 1, kind: input, shape index: {}]   ;;  %s750_s2 = inlined_call_operand.vmem [shape: f32[1,32], index: 2, kind: input, shape index: {}]   ;;  %s751_s3 = inlined_call_operand.hbm [shape: f32[32,32], index: 3, kind: input, shape index: {}]   ;;  %s752_s4 = inlined_call_operand.vmem [shape: f32[1,32], index: 4, kind: input, shape index: {}]   ;;  %s753_s5 = inlined_call_operand.hbm [shape: f32[32,32], index: 5, kind: input, shape index: {}]   ;;  %s754_s6 = inlined_call_operand.vmem [shape: f32[1,32], index: 6, kind: input, shape index: {}]   ;;  %s755_s7 = inlined_call_operand.hbm [shape: f32[32,128], index: 7, kind: input, shape index: {}]   ;;  %s756_s8 = inlined_call_operand.vmem [shape: f32[1,128], index: 8, kind: input, shape index: {}]   ;;  %s757_s9 = inlined_call_operand.hbm [shape: f32[16,128], index: 9, kind: output, shape index: {}]  }
   0x1   :  { %15 = vsyncpa [#allocation6], 0 }
   0x2   :  { %16 = vsyncpa [#allocation9], 0 }
   0x3   :  { %17 = vsyncpa [#allocation4], 0  ;;  %s35_s11 = sshll.u32 %s749_s1, 4  ;;  %s624_s12 = smov [#allocation5]   ;;  %s36_s11 = int_to_ptr.hbm [resolvable:$true] %s35_s11 }
   0x4   :  { %s37_s13 = sshll.u32 %s624_s12, 4  ;;  %s65_s16 = sshll.u32 %s753_s5, 4  ;;  %s38_s13 = int_to_ptr.vmem [resolvable:$true] %s37_s13  ;;  %s66_s16 = int_to_ptr.hbm [resolvable:$true] %s65_s16 }
   0x5   :  { %s625_s17 = smov 128   ;;  %s626_s18 = smov 8  }
   0x6   :  { %43 = dma.hbm_to_vmem [thread:$0]  %s36_s11, 256, %s38_s13, [#allocation6], %s625_s17, %s625_s17, %s626_s18  }
   0x7   :  { %s627_s19 = smov [#allocation8]   ;;  %s22_s1 = sshll.u32 %s748_s0, 4  ;;  %s23_s1 = int_to_ptr.hbm [resolvable:$true] %s22_s1 }
   0x8   :  { %s67_s20 = sshll.u32 %s627_s19, 4  ;;  %s50_s24 = sshll.u32 %s751_s3, 4  ;;  %s68_s20 = int_to_ptr.vmem [resolvable:$true] %s67_s20  ;;  %s51_s24 = int_to_ptr.hbm [resolvable:$true] %s50_s24 }
   0x9   :  { %73 = dma.hbm_to_vmem [thread:$0]  %s66_s16, 512, %s68_s20, [#allocation9], %s625_s17, %s625_s17, %s626_s18  }
   0xa   :  { %s628_s25 = smov [#allocation2]   ;;  %s629_s27 = smov [#allocation7]  }
   0xb   :  { %s24_s26 = sshll.u32 %s628_s25, 4  ;;  %s52_s0 = sshll.u32 %s629_s27, 4  ;;  %s25_s26 = int_to_ptr.vmem [resolvable:$true] %s24_s26  ;;  %s53_s0 = int_to_ptr.vmem [resolvable:$true] %s52_s0 }
   0xc   :  { %30 = dma.hbm_to_vmem [thread:$0]  %s23_s1, 256, %s25_s26, [#allocation3], %s625_s17, %s625_s17, %s626_s18  }
   0xd   :  { %s80_s30 = sshll.u32 %s755_s7, 4  ;;  %s630_s3 = smov [#allocation10]   ;;  %s81_s30 = int_to_ptr.hbm [resolvable:$true] %s80_s30 }
   0xe   :  { %58 = dma.hbm_to_vmem [thread:$0]  %s51_s24, 512, %s53_s0, [#allocation6], %s625_s17, %s625_s17, %s626_s18  }
   0xf   :  { %s82_s10 = sshll.u32 %s630_s3, 4  ;;  %s83_s10 = int_to_ptr.vmem [resolvable:$true] %s82_s10 }
  0x10   :  { %88 = dma.hbm_to_vmem [thread:$0]  %s81_s30, 512, %s83_s10, [#allocation9], %s625_s17, %s625_s17, %s626_s18  }
  0x11   :  { %616 = dma.done.wait [#allocation3], 256  }
  0x12   :  { %617 = vsyncadd [#allocation3], 4294967040 }
  0x13   :  { %618 = dma.done.wait [#allocation6], 768  }
  0x14   :  { %619 = vsyncadd [#allocation6], 4294966528 }
  0x15   :  { %620 = dma.done.wait [#allocation9], 1024  }
  0x16   :  { %621 = vsyncadd [#allocation9], 4294966272  ;;  %v114_v0 = vld [vmem:[#allocation5 + $0x8] sm:$0xff]  ;;  %v113_v1 = vld [vmem:[#allocation5] sm:$0xff]  ;;  %vm119_vm0 = vcmask 130048   ;;  %vm149_vm1 = vcmask 261120  }
  0x17   :  { %140 = vmatpush.msra.mxu0 %v114_v0  ;;  %v111_v2 = vld [vmem:[#allocation2] sm:$0xff]  ;;  %v112_v3 = vld [vmem:[#allocation2 + $0x8] sm:$0xff]  ;;  %v205_v15 = vld [vmem:[#allocation7 + $0x18] sm:$0xff]  ;;  %s631_s15 = smov [#allocation11]   ;;  %s425_s21 = sshll.u32 %s757_s9, 4  ;;  %s426_s21 = int_to_ptr.hbm [resolvable:$true] %s425_s21 }
  0x18   :  { %v456_v4 = vld [vmem:[%s750_s2] ss:$0 sm:$0xff]  ;;  %228 = vmatpush.msra.mxu1 %v205_v15  ;;  %v204_v17 = vld [vmem:[#allocation7 + $0x10] sm:$0xff]  ;;  %v203_v18 = vld [vmem:[#allocation7 + $0x8] sm:$0xff]  ;;  %s423_s16 = sshll.u32 %s631_s15, 4  ;;  %s424_s16 = int_to_ptr.vmem [resolvable:$true] %s423_s16 }
  0x19   :  { %141 = vmatpush.msra.mxu0 %v113_v1  ;;  %v202_v20 = vld [vmem:[#allocation7] sm:$0xff] }
  0x1a   :  { %440 = vmatmul.msk.f32.vlgmr.msra.gmra.mxu0 %vm119_vm0, %v111_v2  ;;  %229 = vmatpush.msra.mxu1 %v204_v17  ;;  %v457_v55 = vld [vmem:[%s752_s4] ss:$0 sm:$0xff]  ;;  %v294_v2 = vld [vmem:[#allocation8 + $0x18] sm:$0xff] }
  0x1b   :  { %317 = vmatpush.msra.mxu2 %v294_v2 }
  0x1c   :  { %230 = vmatpush.msra.mxu1 %v203_v18 }
  0x1e   :  { %231 = vmatpush.msra.mxu1 %v202_v20 }
  0x22   :  { %441 = vmatmul.msk.f32.gmra.mxu0 %vm119_vm0, %v112_v3 }
  0x97   :  { %v143_v5 = vpop.f32.mrf.mxu0 }
  0x98   :  { %v144_v6 = vadd.f32 %v456_v4, %v143_v5  ;;  %v292_v5 = vld [vmem:[#allocation8 + $0x8] sm:$0xff] }
  0x9a   :  { %v150_v7 = vsel %vm149_vm1, %v144_v6, 0.0  ;;  %v158_v8 = vmul.f32 %v144_v6, %v144_v6 }
  0x9b   :  { %151 = vadd.xlane.f32.xlu0 %v150_v7 }
  0x9c   :  { %v160_v12 = vsel %vm149_vm1, %v158_v8, 0.0 }
  0x9f   :  { %v146_v9 = vpop.f32.mrf.mxu0 }
  0xa0   :  { %v147_v10 = vadd.f32 %v456_v4, %v146_v9  ;;  %v293_v4 = vld [vmem:[#allocation8 + $0x10] sm:$0xff] }
  0xa1   :  { %318 = vmatpush.msra.mxu2 %v293_v4 }
  0xa2   :  { %v153_v11 = vsel %vm149_vm1, %v147_v10, 0.0  ;;  %v159_v13 = vmul.f32 %v147_v10, %v147_v10 }
  0xa3   :  { %154 = vadd.xlane.f32.xlu1 %v153_v11  ;;  %161 = vadd.xlane.f32.xlu0 %v160_v12 }
  0xa4   :  { %v163_v14 = vsel %vm149_vm1, %v159_v13, 0.0  ;;  %319 = vmatpush.msra.mxu2 %v292_v5 }
  0xab   :  { %164 = vadd.xlane.f32.xlu1 %v163_v14 }
 0x10e   :  { %v152_v16 = vpop.xlane.xlu0 %151 }
 0x10f   :  { %v156_v19 = vmul.f32 0.03125, %v152_v16 }
 0x111   :  { %v168_v23 = vmul.f32 %v156_v19, %v156_v19  ;;  %v174_v43 = vsub.f32 %v144_v6, %v156_v19  ;;  %v291_v6 = vld [vmem:[#allocation8] sm:$0xff] }
 0x112   :  { %320 = vmatpush.msra.mxu2 %v291_v6 }
 0x116   :  { %v155_v21 = vpop.xlane.xlu1 %154  ;;  %v162_v22 = vpop.xlane.xlu0 %161 }
 0x117   :  { %v166_v24 = vmul.f32 0.03125, %v162_v22  ;;  %v157_v26 = vmul.f32 0.03125, %v155_v21 }
 0x119   :  { %v170_v25 = vsub.f32 %v166_v24, %v168_v23  ;;  %v169_v28 = vmul.f32 %v157_v26, %v157_v26  ;;  %v175_v51 = vsub.f32 %v147_v10, %v157_v26 }
 0x11b   :  { %v172_v27 = vmax.f32 %v170_v25, 0.0 }
 0x11d   :  { %v176_v29 = vadd.f32 1e-05, %v172_v27 }
 0x11e   :  { %v165_v30 = vpop.xlane.xlu1 %164 }
 0x11f   :  { %460 = vrsqrt.f32 %v176_v29  ;;  %v167_v31 = vmul.f32 0.03125, %v165_v30  ;;  %vm184_vm3 = vweird.f32 %v176_v29 }
 0x121   :  { %v171_v32 = vsub.f32 %v167_v31, %v169_v28 }
 0x123   :  { %v173_v33 = vmax.f32 %v171_v32, 0.0 }
 0x125   :  { %v461_v34 = vpop.eup %460  ;;  %v177_v35 = vadd.f32 1e-05, %v173_v33 }
 0x126   :  { %v179_v36 = vmul.f32 %v461_v34, %v176_v29  ;;  %vm185_vm2 = vweird.f32 %v461_v34 }
 0x127   :  { %462 = vrsqrt.f32 %v177_v35  ;;  %vm186_vm4 = vmor %vm184_vm3, %vm185_vm2  ;;  %vm194_vm6 = vweird.f32 %v177_v35 }
 0x128   :  { %v180_v37 = vmul.f32 %v461_v34, %v179_v36 }
 0x12a   :  { %v181_v38 = vmul.f32 0.5, %v180_v37 }
 0x12c   :  { %v182_v39 = vsub.f32 1.5, %v181_v38 }
 0x12d   :  { %v463_v40 = vpop.eup %462 }
 0x12e   :  { %v189_v41 = vmul.f32 %v463_v40, %v177_v35  ;;  %v183_v42 = vmul.f32 %v461_v34, %v182_v39  ;;  %vm195_vm5 = vweird.f32 %v463_v40 }
 0x12f   :  { %vm196_vm7 = vmor %vm194_vm6, %vm195_vm5 }
 0x130   :  { %v190_v44 = vmul.f32 %v463_v40, %v189_v41  ;;  %v187_v45 = vsel %vm186_vm4, %v461_v34, %v183_v42  ;;  %v458_v42 = vld [vmem:[%s754_s6] ss:$0 sm:$0xff] }
 0x131   :  { %v198_v46 = vmul.f32 %v187_v45, %v174_v43 }
 0x132   :  { %v191_v47 = vmul.f32 0.5, %v190_v44 }
 0x133   :  { %v200_v48 = vmax.f32 %v198_v46, 0.0 }
 0x134   :  { %v192_v49 = vsub.f32 1.5, %v191_v47 }
 0x135   :  { %442 = vmatmul.msk.f32.vlgmr.msra.gmra.mxu1 %vm149_vm1, %v200_v48 }
 0x136   :  { %v193_v50 = vmul.f32 %v463_v40, %v192_v49 }
 0x138   :  { %v197_v52 = vsel %vm196_vm7, %v463_v40, %v193_v50 }
 0x139   :  { %v199_v53 = vmul.f32 %v197_v52, %v175_v51 }
 0x13b   :  { %v201_v54 = vmax.f32 %v199_v53, 0.0  ;;  %v383_v53 = vld [vmem:[#allocation10 + $0x18] sm:$0xff] }
 0x13c   :  { %406 = vmatpush.msra.mxu3 %v383_v53 }
 0x13d   :  { %443 = vmatmul.msk.f32.gmra.mxu1 %vm149_vm1, %v201_v54  ;;  %v382_v54 = vld [vmem:[#allocation10 + $0x10] sm:$0xff] }
 0x13e   :  { %407 = vmatpush.msra.mxu3 %v382_v54 }
 0x1b2   :  { %v233_v56 = vpop.f32.mrf.mxu1 }
 0x1b3   :  { %v234_v57 = vadd.f32 %v457_v55, %v233_v56 }
 0x1b5   :  { %v239_v58 = vsel %vm149_vm1, %v234_v57, 0.0  ;;  %v247_v59 = vmul.f32 %v234_v57, %v234_v57 }
 0x1b6   :  { %240 = vadd.xlane.f32.xlu2 %v239_v58 }
 0x1b7   :  { %v249_v63 = vsel %vm149_vm1, %v247_v59, 0.0 }
 0x1ba   :  { %v236_v60 = vpop.f32.mrf.mxu1 }
 0x1bb   :  { %v237_v61 = vadd.f32 %v457_v55, %v236_v60  ;;  %v381_v55 = vld [vmem:[#allocation10 + $0x8] sm:$0xff] }
 0x1bc   :  { %408 = vmatpush.msra.mxu3 %v381_v55 }
 0x1bd   :  { %v242_v62 = vsel %vm149_vm1, %v237_v61, 0.0  ;;  %v248_v0 = vmul.f32 %v237_v61, %v237_v61 }
 0x1be   :  { %243 = vadd.xlane.f32.xlu0 %v242_v62  ;;  %250 = vadd.xlane.f32.xlu2 %v249_v63 }
 0x1bf   :  { %v252_v1 = vsel %vm149_vm1, %v248_v0, 0.0 }
 0x1c0   :  { %253 = vadd.xlane.f32.xlu1 %v252_v1 }
 0x229   :  { %v241_v3 = vpop.xlane.xlu2 %240 }
 0x22a   :  { %v245_v7 = vmul.f32 0.03125, %v241_v3 }
 0x22c   :  { %v257_v10 = vmul.f32 %v245_v7, %v245_v7  ;;  %v263_v33 = vsub.f32 %v234_v57, %v245_v7  ;;  %v380_v57 = vld [vmem:[#allocation10] sm:$0xff] }
 0x22d   :  { %409 = vmatpush.msra.mxu3 %v380_v57 }
 0x231   :  { %v244_v8 = vpop.xlane.xlu0 %243  ;;  %v251_v9 = vpop.xlane.xlu2 %250 }
 0x232   :  { %v246_v11 = vmul.f32 0.03125, %v244_v8  ;;  %v255_v12 = vmul.f32 0.03125, %v251_v9 }
 0x233   :  { %v254_v13 = vpop.xlane.xlu1 %253 }
 0x234   :  { %v258_v14 = vmul.f32 %v246_v11, %v246_v11  ;;  %v259_v15 = vsub.f32 %v255_v12, %v257_v10  ;;  %v256_v16 = vmul.f32 0.03125, %v254_v13  ;;  %v264_v39 = vsub.f32 %v237_v61, %v246_v11 }
 0x236   :  { %v261_v17 = vmax.f32 %v259_v15, 0.0  ;;  %v260_v18 = vsub.f32 %v256_v16, %v258_v14 }
 0x238   :  { %v265_v19 = vadd.f32 1e-05, %v261_v17  ;;  %v262_v20 = vmax.f32 %v260_v18, 0.0 }
 0x23a   :  { %464 = vrsqrt.f32 %v265_v19  ;;  %v266_v21 = vadd.f32 1e-05, %v262_v20  ;;  %vm273_vm9 = vweird.f32 %v265_v19 }
 0x23c   :  { %466 = vrsqrt.f32 %v266_v21  ;;  %vm283_vm12 = vweird.f32 %v266_v21 }
 0x240   :  { %v465_v22 = vpop.eup %464 }
 0x241   :  { %v268_v23 = vmul.f32 %v465_v22, %v265_v19  ;;  %vm274_vm8 = vweird.f32 %v465_v22 }
 0x242   :  { %v467_v24 = vpop.eup %466  ;;  %vm275_vm10 = vmor %vm273_vm9, %vm274_vm8 }
 0x243   :  { %v269_v25 = vmul.f32 %v465_v22, %v268_v23  ;;  %v278_v26 = vmul.f32 %v467_v24, %v266_v21  ;;  %vm284_vm11 = vweird.f32 %v467_v24 }
 0x244   :  { %vm285_vm13 = vmor %vm283_vm12, %vm284_vm11 }
 0x245   :  { %v270_v27 = vmul.f32 0.5, %v269_v25  ;;  %v279_v28 = vmul.f32 %v467_v24, %v278_v26 }
 0x247   :  { %v271_v29 = vsub.f32 1.5, %v270_v27  ;;  %v280_v30 = vmul.f32 0.5, %v279_v28 }
 0x249   :  { %v281_v31 = vsub.f32 1.5, %v280_v30  ;;  %v272_v32 = vmul.f32 %v465_v22, %v271_v29  ;;  %v459_v29 = vld [vmem:[%s756_s8] ss:$0 sm:$0xff] }
 0x24b   :  { %v276_v34 = vsel %vm275_vm10, %v465_v22, %v272_v32  ;;  %v282_v35 = vmul.f32 %v467_v24, %v281_v31 }
 0x24c   :  { %v287_v36 = vmul.f32 %v276_v34, %v263_v33 }
 0x24d   :  { %v286_v38 = vsel %vm285_vm13, %v467_v24, %v282_v35 }
 0x24e   :  { %v289_v37 = vmax.f32 %v287_v36, 0.0  ;;  %v288_v40 = vmul.f32 %v286_v38, %v264_v39 }
 0x250   :  { %444 = vmatmul.msk.f32.vlgmr.msra.gmra.mxu2 %vm149_vm1, %v289_v37  ;;  %v290_v41 = vmax.f32 %v288_v40, 0.0 }
 0x258   :  { %445 = vmatmul.msk.f32.gmra.mxu2 %vm149_vm1, %v290_v41 }
 0x2d3   :  { %v322_v43 = vpop.f32.mrf.mxu2 }
 0x2d4   :  { %v323_v44 = vadd.f32 %v458_v42, %v322_v43 }
 0x2d6   :  { %v328_v45 = vsel %vm149_vm1, %v323_v44, 0.0  ;;  %v336_v46 = vmul.f32 %v323_v44, %v323_v44 }
 0x2d7   :  { %329 = vadd.xlane.f32.xlu2 %v328_v45 }
 0x2d8   :  { %v338_v47 = vsel %vm149_vm1, %v336_v46, 0.0 }
 0x2d9   :  { %339 = vadd.xlane.f32.xlu0 %v338_v47 }
 0x2db   :  { %v325_v48 = vpop.f32.mrf.mxu2 }
 0x2dc   :  { %v326_v49 = vadd.f32 %v458_v42, %v325_v48 }
 0x2de   :  { %v331_v50 = vsel %vm149_vm1, %v326_v49, 0.0  ;;  %v337_v51 = vmul.f32 %v326_v49, %v326_v49 }
 0x2df   :  { %332 = vadd.xlane.f32.xlu1 %v331_v50 }
 0x2e0   :  { %v341_v52 = vsel %vm149_vm1, %v337_v51, 0.0 }
 0x2e1   :  { %342 = vadd.xlane.f32.xlu2 %v341_v52 }
 0x34a   :  { %v330_v56 = vpop.xlane.xlu2 %329 }
 0x34b   :  { %v334_v58 = vmul.f32 0.03125, %v330_v56 }
 0x34c   :  { %v340_v59 = vpop.xlane.xlu0 %339 }
 0x34d   :  { %v346_v60 = vmul.f32 %v334_v58, %v334_v58  ;;  %v344_v61 = vmul.f32 0.03125, %v340_v59  ;;  %v352_v16 = vsub.f32 %v323_v44, %v334_v58 }
 0x34f   :  { %v348_v62 = vsub.f32 %v344_v61, %v346_v60 }
 0x351   :  { %v350_v63 = vmax.f32 %v348_v62, 0.0 }
 0x352   :  { %v333_v0 = vpop.xlane.xlu1 %332 }
 0x353   :  { %v354_v1 = vadd.f32 1e-05, %v350_v63  ;;  %v335_v2 = vmul.f32 0.03125, %v333_v0 }
 0x354   :  { %v343_v3 = vpop.xlane.xlu2 %342 }
 0x355   :  { %468 = vrsqrt.f32 %v354_v1  ;;  %v347_v4 = vmul.f32 %v335_v2, %v335_v2  ;;  %v345_v5 = vmul.f32 0.03125, %v343_v3  ;;  %vm362_vm15 = vweird.f32 %v354_v1 }
 0x356   :  { %v353_v25 = vsub.f32 %v326_v49, %v335_v2 }
 0x357   :  { %v349_v6 = vsub.f32 %v345_v5, %v347_v4 }
 0x359   :  { %v351_v7 = vmax.f32 %v349_v6, 0.0 }
 0x35b   :  { %v469_v8 = vpop.eup %468  ;;  %v355_v10 = vadd.f32 1e-05, %v351_v7 }
 0x35c   :  { %v357_v9 = vmul.f32 %v469_v8, %v354_v1  ;;  %vm363_vm14 = vweird.f32 %v469_v8 }
 0x35d   :  { %470 = vrsqrt.f32 %v355_v10  ;;  %vm364_vm0 = vmor %vm362_vm15, %vm363_vm14  ;;  %vm372_vm3 = vweird.f32 %v355_v10 }
 0x35e   :  { %v358_v11 = vmul.f32 %v469_v8, %v357_v9 }
 0x360   :  { %v359_v12 = vmul.f32 0.5, %v358_v11 }
 0x362   :  { %v360_v13 = vsub.f32 1.5, %v359_v12 }
 0x363   :  { %v471_v14 = vpop.eup %470 }
 0x364   :  { %v361_v15 = vmul.f32 %v469_v8, %v360_v13  ;;  %v367_v17 = vmul.f32 %v471_v14, %v355_v10  ;;  %vm373_vm2 = vweird.f32 %v471_v14 }
 0x365   :  { %vm374_vm4 = vmor %vm372_vm3, %vm373_vm2 }
 0x366   :  { %v365_v18 = vsel %vm364_vm0, %v469_v8, %v361_v15  ;;  %v368_v19 = vmul.f32 %v471_v14, %v367_v17 }
 0x367   :  { %v376_v20 = vmul.f32 %v365_v18, %v352_v16 }
 0x368   :  { %v369_v21 = vmul.f32 0.5, %v368_v19 }
 0x369   :  { %v378_v22 = vmax.f32 %v376_v20, 0.0 }
 0x36a   :  { %v370_v23 = vsub.f32 1.5, %v369_v21 }
 0x36b   :  { %446 = vmatmul.msk.f32.vlgmr.msra.gmra.mxu3 %vm149_vm1, %v378_v22 }
 0x36c   :  { %v371_v24 = vmul.f32 %v471_v14, %v370_v23 }
 0x36e   :  { %v375_v26 = vsel %vm374_vm4, %v471_v14, %v371_v24 }
 0x36f   :  { %v377_v27 = vmul.f32 %v375_v26, %v353_v25 }
 0x371   :  { %v379_v28 = vmax.f32 %v377_v27, 0.0 }
 0x373   :  { %447 = vmatmul.msk.f32.gmra.mxu3 %vm149_vm1, %v379_v28 }
 0x3ee   :  { %v411_v30 = vpop.f32.mrf.mxu3 }
 0x3ef   :  { %v412_v31 = vadd.f32 %v459_v29, %v411_v30 }
 0x3f1   :  { %417 = vst [vmem:[#allocation11] sm:$0xff] %v412_v31 }
 0x3f6   :  { %v414_v32 = vpop.f32.mrf.mxu3 }
 0x3f7   :  { %v415_v33 = vadd.f32 %v459_v29, %v414_v32 }
 0x3f9   :  { %418 = vst [vmem:[#allocation11 + $0x8] sm:$0xff] %v415_v33 }
 0x3fa   :  { %431 = dma.vmem_to_hbm [thread:$0]  %s424_s16, 256, %s426_s21, [#allocation4], %s625_s17, %s625_s17, %s626_s18  }
 0x3fb   :  { %622 = dma.done.wait [#allocation4], 256  }
 0x3fc   :  { %623 = vsyncadd [#allocation4], 4294967040 }
 0x3fd   :  { %436 = vsyncpa [#allocation3], 1 }
 0x3fe   :  { %437 = vsyncpa [#allocation6], 1 }
 0x3ff   :  { %438 = vsyncpa [#allocation9], 1 }
 0x400   :  { %439 = vsyncpa [#allocation4], 1 }

</bundles_post_ra>
